<compile_context>
chip_gen: v7x
topology: tpu7x:2x2x1
jax: 0.10.0
libtpu: 0.0.40
codegen_flags: <defaults>
</compile_context>

<pallas_src>
import math

import jax
import jax.numpy as jnp
from jax.experimental import pallas as pl
from jax.experimental.pallas import tpu as pltpu


def _round_up(v, m):
    return ((v + m - 1) // m) * m


def _lane_group(out_size):
    """How many rows to pack into one 128-lane output row.

    128 keeps full-width stores on every generation; on v6e/v7x (256-wide MXU)
    256 // out_size would fill the MXU output width, but the kernel is
    HBM-bound, so the portable 128 is kept.
    """
    if out_size < 128 and 128 % out_size == 0:
        return 128 // out_size
    return 1   # NOTE: out_size not dividing 128 -> masked stores (perf cliff only).


def _linear_kernel(x_ref, w_ref, b_ref, y_ref, flag_ref):
    x = x_ref[...]                                   # (tm, G*emb), input dtype
    w = w_ref[...]                                   # (G*emb, G*out), compute dtype
    if x.dtype != w.dtype:                           # in-kernel cast (VPU work,
        x = x.astype(w.dtype)                        # hidden under the input DMA)
    acc = jnp.dot(x, w, preferred_element_type=jnp.float32)
    acc = acc + b_ref[...]                           # f32 bias (1, G*out)
    y_ref[...] = acc.astype(y_ref.dtype)
    # Single per-block NaN flag over the f32 accumulator only: any NaN in a
    # valid input row propagates through the matmul (NaN * w sums to NaN), so
    # one N-wide reduction covers both checks; pad rows are zeros (NaN-safe).
    flag_ref[...] = jnp.any(jnp.isnan(acc)).astype(jnp.int32).reshape(1, 1, 1)


def prepare_tcn_decoder_params(weight, bias, *, compute_dtype=jnp.float32):
    """Pack nn.Linear params once (cache this outside the hot loop).

    weight: (out, emb), bias: (out,) ->
      w_packed: (G*emb, G*out) block-diagonal W^T (compute_dtype),
      b_packed: (1, G*out) f32.
    """
    out_size, _ = weight.shape
    group = _lane_group(out_size)
    wt = weight.T.astype(compute_dtype)              # (emb, out)
    if group > 1:
        w_packed = jnp.kron(jnp.eye(group, dtype=compute_dtype), wt)  # 0/1 eye: exact
        b_packed = jnp.tile(bias.astype(jnp.float32), (group,))[None, :]
    else:
        w_packed = wt
        b_packed = bias.astype(jnp.float32)[None, :]
    return w_packed, b_packed


# Conservative VMEM budget / scoped limit that are valid on every generation:
# v5e (16 MiB scoped default, 128 MiB physical), v6e (32/128), v7x (32/64).
_VMEM_BUDGET_BYTES = 28 << 20
_VMEM_LIMIT_BYTES = 48 << 20


def tcn_decoder_pallas(x, w_packed, b_packed, out_size, *,
                       target_packed_rows=4096):
    """x: (..., emb). Returns (y, nan_flag) as device arrays.

    target_packed_rows: row-tile size in packed rows (1 packed row = G original
    rows). ~4096 packed rows amortizes the ~0.35us/step pipeline overhead to a
    few percent of the DMA time; on v7x (3.2 TB/s HBM) ~8192 amortizes even
    better. Either way the tile is capped by the VMEM budget.
    """
    *lead, emb = x.shape
    K, N = w_packed.shape
    group = N // out_size
    assert K == group * emb, "weights not prepared for this out_size/emb"

    M = math.prod(lead) if lead else 1
    in_dtype = x.dtype
    out_dtype = x.dtype
    in_item = jnp.dtype(in_dtype).itemsize
    out_item = jnp.dtype(out_dtype).itemsize
    w_item = jnp.dtype(w_packed.dtype).itemsize

    # ---- tile size from VMEM budget (double-buffered x/y, f32 acc, cast temp).
    per_row = 2 * K * in_item + 2 * N * out_item + N * 4
    if w_packed.dtype != in_dtype:
        per_row += K * w_item                        # in-kernel cast temporary
    resident = 2 * (K * N * w_item + N * 4)          # weight + bias buffers
    tm_cap = max(8, ((_VMEM_BUDGET_BYTES - resident) // per_row) // 8 * 8)
    tm_target = max(8, min(target_packed_rows, tm_cap) // 8 * 8)

    # ---- equal-split blocks: padding waste < 8 packed rows per block, instead
    # of rounding M all the way up to a (large) tile multiple.
    Mp = -(-M // group)                              # packed rows needed
    Mp8 = _round_up(max(Mp, 1), 8)
    num_blocks = -(-Mp8 // tm_target)
    tm = _round_up(-(-Mp8 // num_blocks), 8)         # tm <= tm_target, multiple of 8
    Mp_pad = num_blocks * tm
    M_pad = Mp_pad * group

    x2d = x.reshape(M, emb)
    if M_pad != M:
        # Zero pad (NaN-safe). Only taken when M isn't already aligned to
        # 8*group; aligned inputs go straight to the (free) repack reshape.
        x2d = jnp.pad(x2d, ((0, M_pad - M), (0, 0)))
    xp = x2d.reshape(Mp_pad, K)                      # free row-major reshape

    # Honest advisory numbers: useful FLOPs (no block-diag zeros / pad rows),
    # actual kernel-side HBM bytes.
    cost = pl.CostEstimate(
        flops=2 * M * emb * out_size,
        transcendentals=0,
        bytes_accessed=(Mp_pad * K * in_item + K * N * w_item + N * 4
                        + Mp_pad * N * out_item + num_blocks * 4),
    )

    grid_spec = pltpu.PrefetchScalarGridSpec(
        num_scalar_prefetch=0,
        grid=(num_blocks,),
        in_specs=[
            pl.BlockSpec((tm, K), lambda i: (i, 0)),         # x tile (original dtype)
            pl.BlockSpec((K, N), lambda i: (0, 0)),          # packed weight (resident)
            pl.BlockSpec((1, N), lambda i: (0, 0)),          # f32 bias
        ],
        out_specs=[
            pl.BlockSpec((tm, N), lambda i: (i, 0)),         # lane-dense output tile
            pl.BlockSpec((1, 1, 1), lambda i: (i, 0, 0)),    # merged per-block NaN flag
        ],
    )

    yp, flags = pl.pallas_call(
        _linear_kernel,
        out_shape=(
            jax.ShapeDtypeStruct((Mp_pad, N), out_dtype),
            jax.ShapeDtypeStruct((num_blocks, 1, 1), jnp.int32),
        ),
        grid_spec=grid_spec,
        compiler_params=pltpu.CompilerParams(
            # Blocks are independent -> megacore-shardable row axis.
            # NOTE: on v7x, profile that both TensorCores are busy; if not,
            # switch this axis to pltpu.CORE_PARALLEL.
            dimension_semantics=("parallel",),
            vmem_limit_bytes=_VMEM_LIMIT_BYTES,
        ),
        cost_estimate=cost,
    )(xp, w_packed, b_packed)

    y = yp.reshape(M_pad, out_size)[:M].reshape(*lead, out_size)
    nan_flag = jnp.any(flags != 0)                   # device-side OR-reduce
    return y, nan_flag


def tcn_decoder_forward(x, weight, bias, *, compute_dtype=None, check_nan=True,
                        target_packed_rows=4096, min_pallas_rows=4096,
                        prepared=None):
    """Mimics TCNDecoder.forward (NaN checks + Linear over the last dim).

    check_nan=False skips the device->host sync in hot loops (the flag is still
    available via tcn_decoder_pallas). `prepared` lets callers cache the packed
    weights across calls instead of re-packing every step.
    """
    out_size = weight.shape[0]
    M = math.prod(x.shape[:-1]) if x.ndim > 1 else 1

    if M < min_pallas_rows:
        # Small-M fallback: the fixed pallas_call/pipeline cost dominates tiny
        # inputs; XLA fuses this trivially.
        y = x @ weight.T.astype(x.dtype) + bias.astype(x.dtype)
        if check_nan:
            if bool(jnp.any(jnp.isnan(x))):
                print('NaN detected in TCNDecoder input!')
                return None
            if bool(jnp.any(jnp.isnan(y))):
                print('NaN detected in TCNDecoder output!')
                return None
        return y

    cd = compute_dtype if compute_dtype is not None else x.dtype
    if prepared is None:
        prepared = prepare_tcn_decoder_params(weight, bias, compute_dtype=cd)
    w_packed, b_packed = prepared
    y, nan_flag = tcn_decoder_pallas(x, w_packed, b_packed, out_size,
                                     target_packed_rows=target_packed_rows)
    if check_nan and bool(nan_flag):                 # host sync only when checking
        # Rare slow path: disambiguate input vs output NaN for the exact
        # TCNDecoder messages (any input NaN propagates into the kernel flag).
        if bool(jnp.any(jnp.isnan(x))):
            print('NaN detected in TCNDecoder input!')
        else:
            print('NaN detected in TCNDecoder output!')
        return None
    return y


if __name__ == "__main__":
    # Shapes implied by the module: x (batch, seq, emb_dim); fc: emb_dim -> output_size.
    batch, seq, emb_dim, output_size = 2, 8, 32, 16

    key = jax.random.PRNGKey(0)
    kx, kw, kb = jax.random.split(key, 3)
    x = jax.random.normal(kx, (batch, seq, emb_dim), dtype=jnp.float32)
    bound = 1.0 / math.sqrt(emb_dim)
    weight = jax.random.uniform(kw, (output_size, emb_dim), jnp.float32, -bound, bound)
    bias = jax.random.uniform(kb, (output_size,), jnp.float32, -bound, bound)

    y_ref = x @ weight.T + bias

    # f32 compute path through the Pallas kernel (min_pallas_rows=0 forces the
    # Pallas path at this tiny demo size); params packed once and reused.
    prepared_f32 = prepare_tcn_decoder_params(weight, bias, compute_dtype=jnp.float32)
    y = tcn_decoder_forward(x, weight, bias, compute_dtype=jnp.float32,
                            min_pallas_rows=0, prepared=prepared_f32)
    assert y is not None and y.shape == (batch, seq, output_size)
    jax.block_until_ready(y)
    assert jnp.allclose(y, y_ref, atol=1e-5, rtol=1e-5), "f32 mismatch vs reference"

    # bf16 compute path: x stays f32 in HBM, the cast happens inside the kernel.
    prepared_bf16 = prepare_tcn_decoder_params(weight, bias, compute_dtype=jnp.bfloat16)
    y_bf16 = tcn_decoder_forward(x, weight, bias, compute_dtype=jnp.bfloat16,
                                 min_pallas_rows=0, prepared=prepared_bf16)
    assert y_bf16 is not None
    jax.block_until_ready(y_bf16)
    assert jnp.allclose(y_bf16.astype(jnp.float32), y_ref, atol=1e-1, rtol=1e-1), \
        "bf16 mismatch vs reference"

    # Ragged M across multiple grid blocks (equal-split tiles + tail padding).
    xr = jax.random.normal(kx, (3, 37, emb_dim), dtype=jnp.float32)   # M = 111 rows
    yr, flag_r = tcn_decoder_pallas(xr, *prepared_f32, output_size,
                                    target_packed_rows=8)             # force >1 block
    jax.block_until_ready(yr)
    yr_ref = xr @ weight.T + bias
    assert yr.shape == yr_ref.shape
    assert jnp.allclose(yr, yr_ref, atol=1e-5, rtol=1e-5), "ragged-M mismatch"
    assert not bool(flag_r), "spurious NaN flag"

    # NaN propagation check (flag only; no wrapper print, keeps stdout clean).
    x_nan = x.at[1, 3, 7].set(jnp.nan)
    _, flag_nan = tcn_decoder_pallas(x_nan, *prepared_f32, output_size)
    assert bool(flag_nan), "NaN in input was not detected"

    print("KERNEL_OK")
</pallas_src>

<mosaic_0001>
module attributes {stable_mosaic.version = 11 : i64} {
  func.func @_linear_kernel(%arg0: i32, %arg1: memref<8x256xf32, #tpu.memory_space<vmem>>, %arg2: memref<256x128xf32, #tpu.memory_space<vmem>>, %arg3: memref<1x128xf32, #tpu.memory_space<vmem>>, %arg4: memref<8x128xf32, #tpu.memory_space<vmem>>, %arg5: memref<1x1x1xi32, #tpu.memory_space<vmem>>) attributes {dimension_semantics = [#tpu.dimension_semantics<parallel>], iteration_bounds = array<i64: 1>, scalar_prefetch = 0 : i64, scratch_operands = 0 : i64, tpu.core_type = #tpu.core_type<tc>, window_params = [{transform_indices = @transform_0, window_bounds = array<i64: 8, 256>}, {pipeline_mode = #tpu.pipeline_mode<synchronous>, transform_indices = @transform_1, window_bounds = array<i64: 256, 128>}, {pipeline_mode = #tpu.pipeline_mode<synchronous>, transform_indices = @transform_2, window_bounds = array<i64: 1, 128>}, {transform_indices = @transform_3, window_bounds = array<i64: 8, 128>}, {transform_indices = @transform_4, window_bounds = array<i64: 1, 1, 1>}]} {
    %c0 = arith.constant 0 : index
    %c0_0 = arith.constant 0 : index
    %0 = vector.load %arg1[%c0, %c0_0] : memref<8x256xf32, #tpu.memory_space<vmem>>, vector<8x256xf32>
    %c0_1 = arith.constant 0 : index
    %c0_2 = arith.constant 0 : index
    %1 = vector.load %arg2[%c0_1, %c0_2] : memref<256x128xf32, #tpu.memory_space<vmem>>, vector<256x128xf32>
    %cst = arith.constant dense<0.000000e+00> : vector<8x128xf32>
    %2 = tpu.matmul %0, %1, %cst {dimension_numbers = #tpu.dot_dimension_numbers<[1], [0], [0], [1], [0, 0, 1, 1], [], []>} : vector<8x256xf32>, vector<256x128xf32>, vector<8x128xf32> -> vector<8x128xf32>
    %c0_3 = arith.constant 0 : index
    %c0_4 = arith.constant 0 : index
    %3 = vector.load %arg3[%c0_3, %c0_4] : memref<1x128xf32, #tpu.memory_space<vmem>>, vector<1x128xf32>
    %4 = vector.broadcast %3 : vector<1x128xf32> to vector<8x128xf32>
    %5 = arith.addf %2, %4 : vector<8x128xf32>
    %c0_5 = arith.constant 0 : index
    %c0_6 = arith.constant 0 : index
    %6 = vector.load %arg4[%c0_5, %c0_6] : memref<8x128xf32, #tpu.memory_space<vmem>>, vector<8x128xf32>
    tpu.vector_store %arg4[%c0_5, %c0_6], %5 {strides = array<i32>} : memref<8x128xf32, #tpu.memory_space<vmem>>, vector<8x128xf32>,
    %7 = arith.cmpf one, %5, %5 : vector<8x128xf32>
    %cst_7 = arith.constant 1.000000e+00 : f32
    %cst_8 = arith.constant 0.000000e+00 : f32
    %8 = vector.broadcast %cst_7 : f32 to vector<8x128xf32>
    %9 = vector.broadcast %cst_8 : f32 to vector<8x128xf32>
    %10 = arith.select %7, %8, %9 : vector<8x128xi1>, vector<8x128xf32>
    %11 = vector.shape_cast %10 : vector<8x128xf32> to vector<1x8x128xf32>
    %cst_9 = arith.constant dense<0xFF800000> : vector<1xf32>
    %12 = vector.multi_reduction <maximumf>, %11, %cst_9 [1, 2] : vector<1x8x128xf32> to vector<1xf32>
    %13 = vector.shape_cast %12 : vector<1xf32> to vector<1x1x1xf32>
    %14 = vector.extract %13[0, 0, 0] : f32 from vector<1x1x1xf32>
    %cst_10 = arith.constant 0.000000e+00 : f32
    %15 = arith.cmpf ogt, %14, %cst_10 : f32
    %16 = arith.extui %15 : i1 to i32
    %17 = vector.broadcast %16 : i32 to vector<1x1x1xi32>
    %c0_11 = arith.constant 0 : index
    %c0_12 = arith.constant 0 : index
    %c0_13 = arith.constant 0 : index
    %18 = vector.load %arg5[%c0_11, %c0_12, %c0_13] : memref<1x1x1xi32, #tpu.memory_space<vmem>>, vector<1x1x1xi32>
    tpu.vector_store %arg5[%c0_11, %c0_12, %c0_13], %17 {strides = array<i32>} : memref<1x1x1xi32, #tpu.memory_space<vmem>>, vector<1x1x1xi32>,
    return
  }
  func.func @transform_0(%arg0: i32) -> (i32, i32) {
    %c0_i32 = arith.constant 0 : i32
    %c0_i32_0 = arith.constant 0 : i32
    return %arg0, %c0_i32 : i32, i32
  }
  func.func @transform_1(%arg0: i32) -> (i32, i32) {
    %c0_i32 = arith.constant 0 : i32
    %c0_i32_0 = arith.constant 0 : i32
    %c0_i32_1 = arith.constant 0 : i32
    return %c0_i32, %c0_i32_0 : i32, i32
  }
  func.func @transform_2(%arg0: i32) -> (i32, i32) {
    %c0_i32 = arith.constant 0 : i32
    %c0_i32_0 = arith.constant 0 : i32
    %c0_i32_1 = arith.constant 0 : i32
    return %c0_i32, %c0_i32_0 : i32, i32
  }
  func.func @transform_3(%arg0: i32) -> (i32, i32) {
    %c0_i32 = arith.constant 0 : i32
    %c0_i32_0 = arith.constant 0 : i32
    return %arg0, %c0_i32 : i32, i32
  }
  func.func @transform_4(%arg0: i32) -> (i32, i32, i32) {
    %c0_i32 = arith.constant 0 : i32
    %c0_i32_0 = arith.constant 0 : i32
    %c0_i32_1 = arith.constant 0 : i32
    return %arg0, %c0_i32, %c0_i32_0 : i32, i32, i32
  }
}

</mosaic_0001>

<bundles_post_ra>
// kernel: tpu_custom_call.1
= control target key start
LH: loop header
LB: loop body
LE: loop exit
PB: predicated region body
PF: predicated region fallthrough
CT: control target
= control target key end

     0   :  { %10 = vsyncpa [#allocation3], 0  ;;  %s465_s0 = inlined_call_operand.hbm [shape: f32[8,256], index: 0, kind: input, shape index: {}]   ;;  %s466_s1 = inlined_call_operand.hbm [shape: f32[256,128], index: 1, kind: input, shape index: {}]   ;;  %s467_s2 = inlined_call_operand.vmem [shape: f32[1,128], index: 2, kind: input, shape index: {}]   ;;  %s468_s3 = inlined_call_operand.hbm [shape: f32[8,128], index: 3, kind: output, shape index: {0}]   ;;  %s469_s4 = inlined_call_operand.hbm [shape: s32[1,1,1], index: 4, kind: output, shape index: {1}]  }
   0x1   :  { %11 = vsyncpa [#allocation6], 0 }
   0x2   :  { %12 = vsyncpa [#allocation4], 0 }
   0x3   :  { %13 = vsyncpa [#allocation9], 0  ;;  %s375_s15 = smov [#allocation2]   ;;  %s376_s17 = smov [#allocation5]  }
   0x4   :  { %s20_s16 = sshll.u32 %s375_s15, 4  ;;  %s29_s18 = sshll.u32 %s376_s17, 4  ;;  %s21_s16 = int_to_ptr.vmem [resolvable:$true] %s20_s16  ;;  %s407_s18 = int_to_ptr.vmem [resolvable:$true] %s29_s18 }
   0x5   :  { %s279_s21 = scalar_lea.hbm %s465_s0, 256 }
   0x6   :  { %p280_p0 = scmp.ne.s32.totalorder %s465_s0, %s279_s21  ;;  %p283_p1 = scmp.lt.u32.totalorder %s279_s21, %s465_s0 }
   0x8   :  { %p285_p2 = pnand %p283_p1, %p280_p0 }
   0xa   :  { %288 = shalt.err (!%p285_p2)
}
   0xb   :  { %s289_s26 = scalar_lea.vmem %s21_s16, 256  ;;  %p294_p4 = scmp.lt.s32.totalorder %s21_s16, %s21_s16 }
   0xc   :  { %p290_p3 = scmp.ne.s32.totalorder %s21_s16, %s289_s26  ;;  %p295_p5 = scmp.lt.s32.totalorder %s289_s26, %s289_s26 }
   0xe   :  { %p296_p6 = por %p295_p5, %p294_p4 }
  0x10   :  { %p297_p7 = pnand %p296_p6, %p290_p3 }
  0x12   :  { %300 = shalt.err (!%p297_p7)
}
  0x13   :  { %23 = dma.hbm_to_vmem [thread:$0]  %s465_s0, 256, %s21_s16, [#allocation3]  }
  0x14   :  { %s301_s5 = scalar_lea.hbm %s466_s1, 4096 }
  0x15   :  { %p302_p8 = scmp.ne.s32.totalorder %s466_s1, %s301_s5  ;;  %p305_p9 = scmp.lt.u32.totalorder %s301_s5, %s466_s1 }
  0x17   :  { %p307_p10 = pnand %p305_p9, %p302_p8 }
  0x19   :  { %310 = shalt.err (!%p307_p10)
}
  0x1a   :  { %s311_s10 = scalar_lea.vmem %s407_s18, 4096  ;;  %p316_p12 = scmp.lt.s32.totalorder %s407_s18, %s407_s18 }
  0x1b   :  { %p312_p11 = scmp.ne.s32.totalorder %s407_s18, %s311_s10  ;;  %p317_p13 = scmp.lt.s32.totalorder %s311_s10, %s311_s10 }
  0x1d   :  { %p318_p0 = por %p317_p13, %p316_p12 }
  0x1f   :  { %p319_p1 = pnand %p318_p0, %p312_p11 }
  0x21   :  { %322 = shalt.err (!%p319_p1)
}
  0x22   :  { %s377_s0 = smov 128   ;;  %s378_s11 = smov 8  }
  0x23   :  { %35 = dma.hbm_to_vmem [thread:$0]  %s466_s1, 4096, %s407_s18, [#allocation6], %s377_s0, %s377_s0, %s378_s11  }
  0x24   :  { %367 = dma.done.wait [#allocation3], 256  }
  0x25   :  { %368 = vsyncadd [#allocation3], 4294967040 }
  0x26   :  { %369 = dma.done.wait [#allocation6], 4096  }
  0x27   :  { %370 = vsyncadd [#allocation6], 4294963200  ;;  %v62_v0 = vld [vmem:[#allocation5 + $0x80] sm:$0xff]  ;;  %v63_v1 = vld [vmem:[#allocation5 + $0x88] sm:$0xff]  ;;  %v379_v55 = vmov 0.0   ;;  %s380_s15 = smov [#allocation7]  }
  0x28   :  { %v46_v2 = vld [vmem:[#allocation5] sm:$0xff]  ;;  %v238_v3 = vpack.c.bf16 %v63_v1, %v62_v0  ;;  %v47_v4 = vld [vmem:[#allocation5 + $0x8] sm:$0xff]  ;;  %v64_v5 = vld [vmem:[#allocation5 + $0x90] sm:$0xff]  ;;  %s178_s16 = sshll.u32 %s380_s15, 4  ;;  %s179_s16 = int_to_ptr.vmem [resolvable:$true] %s178_s16 }
  0x29   :  { %v65_v6 = vld [vmem:[#allocation5 + $0x98] sm:$0xff]  ;;  %v240_v7 = vpack.c.bf16 %v47_v4, %v46_v2  ;;  %v48_v9 = vld [vmem:[#allocation5 + $0x10] sm:$0xff]  ;;  %v66_v11 = vld [vmem:[#allocation5 + $0xa0] sm:$0xff]  ;;  %s323_s17 = scalar_lea.vmem %s179_s16, 128  ;;  %p328_p3 = scmp.lt.s32.totalorder %s179_s16, %s179_s16 }
  0x2a   :  { %v242_v8 = vpack.c.bf16 %v65_v6, %v64_v5  ;;  %v49_v10 = vld [vmem:[#allocation5 + $0x18] sm:$0xff]  ;;  %239 = vmatprep.subr.bf16.mxu0 %v238_v3  ;;  %v67_v12 = vld [vmem:[#allocation5 + $0xa8] sm:$0xff]  ;;  %v50_v15 = vld [vmem:[#allocation5 + $0x20] sm:$0xff]  ;;  %p324_p2 = scmp.ne.s32.totalorder %s179_s16, %s323_s17  ;;  %p329_p4 = scmp.lt.s32.totalorder %s323_s17, %s323_s17 }
  0x2b   :  { %241 = vmatpush3.bf16.msra.mxu0 %v240_v7  ;;  %v244_v13 = vpack.c.bf16 %v49_v10, %v48_v9  ;;  %v246_v14 = vpack.c.bf16 %v67_v12, %v66_v11  ;;  %v51_v16 = vld [vmem:[#allocation5 + $0x28] sm:$0xff]  ;;  %v68_v17 = vld [vmem:[#allocation5 + $0xb0] sm:$0xff]  ;;  %v69_v18 = vld [vmem:[#allocation5 + $0xb8] sm:$0xff] }
  0x2c   :  { %243 = vmatprep.subr.bf16.mxu0 %v242_v8  ;;  %v248_v19 = vpack.c.bf16 %v51_v16, %v50_v15  ;;  %v250_v20 = vpack.c.bf16 %v69_v18, %v68_v17  ;;  %v52_v21 = vld [vmem:[#allocation5 + $0x30] sm:$0xff]  ;;  %v53_v22 = vld [vmem:[#allocation5 + $0x38] sm:$0xff]  ;;  %v70_v23 = vld [vmem:[#allocation5 + $0xc0] sm:$0xff]  ;;  %p330_p5 = por %p329_p4, %p328_p3 }
  0x2d   :  { %v71_v24 = vld [vmem:[#allocation5 + $0xc8] sm:$0xff]  ;;  %v45_v25 = vld [vmem:[#allocation2 + $0x8] sm:$0xff]  ;;  %v252_v26 = vpack.c.bf16 %v53_v22, %v52_v21  ;;  %v54_v28 = vld [vmem:[#allocation5 + $0x40] sm:$0xff] }
  0x2e   :  { %149 = vmatprep.mubr.f32.mxu0 %v45_v25  ;;  %v254_v27 = vpack.c.bf16 %v71_v24, %v70_v23  ;;  %v55_v29 = vld [vmem:[#allocation5 + $0x48] sm:$0xff]  ;;  %v72_v30 = vld [vmem:[#allocation5 + $0xd0] sm:$0xff]  ;;  %v73_v31 = vld [vmem:[#allocation5 + $0xd8] sm:$0xff]  ;;  %p331_p6 = pnand %p330_p5, %p324_p2 }
  0x2f   :  { %245 = vmatpush3.bf16.msra.mxu0 %v244_v13  ;;  %v256_v32 = vpack.c.bf16 %v55_v29, %v54_v28  ;;  %v258_v33 = vpack.c.bf16 %v73_v31, %v72_v30  ;;  %v56_v34 = vld [vmem:[#allocation5 + $0x50] sm:$0xff]  ;;  %v57_v35 = vld [vmem:[#allocation5 + $0x58] sm:$0xff]  ;;  %v74_v36 = vld [vmem:[#allocation5 + $0xe0] sm:$0xff] }
  0x30   :  { %247 = vmatprep.subr.bf16.mxu0 %v246_v14  ;;  %v75_v37 = vld [vmem:[#allocation5 + $0xe8] sm:$0xff]  ;;  %v260_v38 = vpack.c.bf16 %v57_v35, %v56_v34  ;;  %v58_v40 = vld [vmem:[#allocation5 + $0x60] sm:$0xff]  ;;  %v76_v42 = vld [vmem:[#allocation5 + $0xf0] sm:$0xff] }
  0x31   :  { %v262_v39 = vpack.c.bf16 %v75_v37, %v74_v36  ;;  %v59_v41 = vld [vmem:[#allocation5 + $0x68] sm:$0xff]  ;;  %v77_v43 = vld [vmem:[#allocation5 + $0xf8] sm:$0xff]  ;;  %v60_v46 = vld [vmem:[#allocation5 + $0x70] sm:$0xff] }
  0x32   :  { %v264_v44 = vpack.c.bf16 %v59_v41, %v58_v40  ;;  %v266_v45 = vpack.c.bf16 %v77_v43, %v76_v42  ;;  %v61_v47 = vld [vmem:[#allocation5 + $0x78] sm:$0xff]  ;;  %v44_v49 = vld [vmem:[#allocation2] sm:$0xff] }
  0x33   :  { %249 = vmatpush3.bf16.msra.mxu0 %v248_v19  ;;  %v268_v48 = vpack.c.bf16 %v61_v47, %v60_v46  ;;  %v202_v51 = vld [vmem:[%s467_s2] ss:$0 sm:$0xff] }
  0x34   :  { %251 = vmatprep.subr.bf16.mxu0 %v250_v20 }
  0x37   :  { %253 = vmatpush3.bf16.msra.mxu0 %v252_v26 }
  0x38   :  { %255 = vmatprep.subr.bf16.mxu0 %v254_v27 }
  0x3b   :  { %257 = vmatpush3.bf16.msra.mxu0 %v256_v32 }
  0x3c   :  { %259 = vmatprep.subr.bf16.mxu0 %v258_v33 }
  0x3f   :  { %261 = vmatpush3.bf16.msra.mxu0 %v260_v38 }
  0x40   :  { %263 = vmatprep.subr.bf16.mxu0 %v262_v39 }
  0x43   :  { %265 = vmatpush3.bf16.msra.mxu0 %v264_v44 }
  0x44   :  { %267 = vmatprep.subr.bf16.mxu0 %v266_v45 }
  0x47   :  { %269 = vmatpush3.bf16.msra.mxu0 %v268_v48 }
  0x4a   :  { %150 = vmatmul.mubr.f32.vlgmr.msra.gmra.mrb[0].mxu0 %v44_v49 }
 0x11d   :  { %v235_v50 = vpop.f32.mrb[0].mxu0 }
 0x11e   :  { %v236_v52 = vpop.f32.mrb[1].mxu0 }
 0x11f   :  { %v237_v53 = vadd.f32 %v236_v52, %v235_v50 }
 0x121   :  { %v152_v54 = vadd.f32 %v237_v53, %v202_v51 }
 0x123   :  { %155 = vst [vmem:[#allocation7] sm:$0xff] %v152_v54  ;;  %vm156_vm0 = vcmp.ne.f32.partialorder %v152_v54, %v152_v54 }
 0x124   :  { %v157_v56 = vsel %vm156_vm0, 1.0, %v379_v55 }
 0x125   :  { %158 = vmax.xlane.f32.xlu0 %v157_v56 }
 0x126   :  { %334 = shalt.err (!%p331_p6)
}
 0x127   :  { %s335_s19 = scalar_lea.hbm %s468_s3, 128 }
 0x128   :  { %p336_p7 = scmp.ne.s32.totalorder %s468_s3, %s335_s19  ;;  %p339_p8 = scmp.lt.u32.totalorder %s335_s19, %s468_s3 }
 0x12a   :  { %p341_p9 = pnand %p339_p8, %p336_p7 }
 0x12c   :  { %344 = shalt.err (!%p341_p9)
}
 0x12d   :  { %181 = dma.vmem_to_hbm [thread:$0]  %s179_s16, 128, %s468_s3, [#allocation4]   ;;  %vm170_vm1 = vcmask 0  }
 0x12e   :  { %s381_s27 = smov [#allocation8]  }
 0x12f   :  { %s188_s28 = sshll.u32 %s381_s27, 4  ;;  %s189_s28 = int_to_ptr.vmem [resolvable:$true] %s188_s28 }
 0x130   :  { %s345_s30 = scalar_lea.vmem %s189_s28, 16  ;;  %s349_s3 = scalar_lea.vmem %s189_s28, 32 }
 0x131   :  { %p346_p11 = scmp.ne.s32.totalorder %s189_s28, %s345_s30  ;;  %p350_p12 = scmp.lt.s32.totalorder %s189_s28, %s189_s28 }
 0x132   :  { %p351_p13 = scmp.lt.s32.totalorder %s349_s3, %s345_s30 }
 0x134   :  { %p352_p0 = por %p351_p13, %p350_p12 }
 0x136   :  { %p353_p1 = pnand %p352_p0, %p346_p11 }
 0x1b2   :  { %v159_v57 = vpop.xlane.xlu0 %158 }
 0x1b3   :  { %v160_v58 = vrot.slane %v159_v57, 4 }
 0x1b5   :  { %v161_v59 = vmax.f32 %v159_v57, %v160_v58 }
 0x1b7   :  { %v162_v60 = vrot.slane %v161_v59, 2 }
 0x1b9   :  { %v163_v61 = vmax.f32 %v161_v59, %v162_v60 }
 0x1bb   :  { %v164_v62 = vrot.slane %v163_v61, 1 }
 0x1bd   :  { %v165_v63 = vmax.f32 %v163_v61, %v164_v62 }
 0x1bf   :  { %270 = vpush %v165_v63 }
 0x1f0   :  { %s271_s26 = spop %270 }
 0x1f1   :  { %p167_p10 = scmp.gt.f32.partialorder %s271_s26, 0.0 }
 0x1f3   :  { %s168_s29 = scalar_select %p167_p10, 1, 0 }
 0x1f5   :  { %v169_v0 = vstv %s168_s29 }
 0x1f6   :  { %171 = vst.msk [vmem:[#allocation8] sm:$0x1] %vm170_vm1, %v169_v0 }
 0x1f7   :  { %356 = shalt.err (!%p353_p1)
}
 0x1f8   :  { %s357_s7 = scalar_lea.hbm %s469_s4, 16 }
 0x1f9   :  { %p358_p2 = scmp.ne.s32.totalorder %s469_s4, %s357_s7  ;;  %p361_p3 = scmp.lt.u32.totalorder %s357_s7, %s469_s4 }
 0x1fb   :  { %p363_p4 = pnand %p361_p3, %p358_p2 }
 0x1fd   :  { %366 = shalt.err (!%p363_p4)
}
 0x1fe   :  { %191 = dma.vmem_to_hbm [thread:$0]  %s189_s28, 16, %s469_s4, [#allocation9]  }
 0x1ff   :  { %371 = dma.done.wait [#allocation4], 128  }
 0x200   :  { %372 = vsyncadd [#allocation4], 4294967168 }
 0x201   :  { %373 = dma.done.wait [#allocation9], 16  }
 0x202   :  { %374 = vsyncadd [#allocation9], 4294967280 }
 0x203   :  { %198 = vsyncpa [#allocation3], 1 }
 0x204   :  { %199 = vsyncpa [#allocation6], 1 }
 0x205   :  { %200 = vsyncpa [#allocation4], 1 }
 0x206   :  { %201 = vsyncpa [#allocation9], 1 }

</bundles_post_ra>
